<compile_context>
chip_gen: v7x
topology: tpu7x:2x2x1
jax: 0.10.0
libtpu: 0.0.40
codegen_flags: <defaults>
</compile_context>

<pallas_src>
import jax
import jax.numpy as jnp
from jax.experimental import pallas as pl
from jax.experimental.pallas import tpu as pltpu


def basic1_forward(x_nchw, conv_w, gamma, beta, eps=1e-5):
    """Basic1.forward for stride=1.

    x_nchw : (N, Cin, H, W) float32
    conv_w : (Cout, Cin, 3, 3) float32 (PyTorch OIHW)
    gamma, beta : (Cout,) float32
    returns (N, Cout, H, W) float32
    """
    # TODO(synk): stride > 1 not implemented (Basic1 default stride=1).
    # TODO(synk): for large images/channels (v7x 64 MiB VMEM) tile H/Cout with a
    #             halo DMA instead of one whole image per grid step.
    N, Cin, H, W = x_nchw.shape
    Cout = conv_w.shape[0]
    Wp = W + 2
    L = (H + 2) * Wp              # flattened padded-image length
    Jv = H * Wp                   # conv-result columns we keep per image
    HW = H * W
    # flat length must cover the largest tap offset (2*Wp + 2) plus Jv,
    # rounded up to a lane-dense multiple of 128
    L_pad = ((L + 2 + 127) // 128) * 128

    # ---- wrapper-side prep (one cheap pass over the input, tiny weights) ----
    xsp = jnp.pad(x_nchw, ((0, 0), (0, 0), (1, 1), (1, 1)))     # spatial pad=1
    xflat = xsp.reshape(N, Cin, L)
    xflat = jnp.pad(xflat, ((0, 0), (0, 0), (0, L_pad - L)))    # lane padding
    # OIHW -> (Cout, 9*Cin), column index = (dy*3+dx)*Cin + ci ; bf16 for MXU
    w_cat = jnp.transpose(conv_w, (0, 2, 3, 1)).reshape(Cout, 9 * Cin)
    w_cat = w_cat.astype(jnp.bfloat16)

    # ---- kernel 1: conv3x3 + per-image BN partial statistics ----------------
    def conv_stats_kernel(xf_ref, w_ref, y_ref, sum_ref, ssq_ref):
        xf = xf_ref[0]                                  # (Cin, L_pad) f32
        pieces = []
        for dy in range(3):
            for dx in range(3):
                ofs = dy * Wp + dx                      # static lane offset
                pieces.append(xf[:, ofs:ofs + Jv])      # (Cin, Jv)
        stacked = jnp.concatenate(pieces, axis=0).astype(jnp.bfloat16)  # (9Cin, Jv)
        acc = jnp.dot(w_ref[...], stacked,
                      preferred_element_type=jnp.float32)               # (Cout, Jv)
        # drop the 2-column gutter of each padded row -> lane-dense (Cout, H*W)
        out2d = acc.reshape(Cout, H, Wp)[:, :, :W].reshape(Cout, HW)
        y_ref[0] = out2d
        # BN partial statistics (per image, per channel) ride along for free
        sum_ref[0] = jnp.sum(out2d, axis=1, keepdims=True)
        ssq_ref[0] = jnp.sum(out2d * out2d, axis=1, keepdims=True)

    y2d, sums, ssqs = pl.pallas_call(
        conv_stats_kernel,
        out_shape=(
            jax.ShapeDtypeStruct((N, Cout, HW), jnp.float32),
            jax.ShapeDtypeStruct((N, Cout, 1), jnp.float32),
            jax.ShapeDtypeStruct((N, Cout, 1), jnp.float32),
        ),
        grid=(N,),
        in_specs=[
            pl.BlockSpec((1, Cin, L_pad), lambda n: (n, 0, 0)),
            pl.BlockSpec((Cout, 9 * Cin), lambda n: (0, 0)),
        ],
        out_specs=(
            pl.BlockSpec((1, Cout, HW), lambda n: (n, 0, 0)),
            pl.BlockSpec((1, Cout, 1), lambda n: (n, 0, 0)),
            pl.BlockSpec((1, Cout, 1), lambda n: (n, 0, 0)),
        ),
        compiler_params=pltpu.CompilerParams(dimension_semantics=("parallel",)),
    )(xflat, w_cat)

    # ---- tiny (N, Cout) reduction + BN affine folding in plain JAX ----------
    # Training-mode BatchNorm2d: biased variance over (N, H, W).
    # TODO(synk): running_mean/running_var state updates are not replicated.
    cnt = jnp.float32(N * HW)
    mean = jnp.sum(sums[:, :, 0], axis=0) / cnt
    var = jnp.maximum(jnp.sum(ssqs[:, :, 0], axis=0) / cnt - mean * mean, 0.0)
    scale = gamma * jax.lax.rsqrt(var + eps)
    shift = beta - mean * scale
    scale2 = scale.reshape(Cout, 1).astype(jnp.float32)
    shift2 = shift.reshape(Cout, 1).astype(jnp.float32)

    # ---- kernel 2: fused affine BN + ReLU, in place over y2d ----------------
    tl = 128 if HW % 128 == 0 else HW
    nt = HW // tl

    def bn_relu_kernel(y_ref, scale_ref, shift_ref, out_ref):
        z = y_ref[0] * scale_ref[...] + shift_ref[...]
        out_ref[0] = jnp.maximum(z, 0.0)

    out2d = pl.pallas_call(
        bn_relu_kernel,
        out_shape=jax.ShapeDtypeStruct((N, Cout, HW), jnp.float32),
        grid=(N, nt),
        in_specs=[
            pl.BlockSpec((1, Cout, tl), lambda n, t: (n, 0, t)),
            pl.BlockSpec((Cout, 1), lambda n, t: (0, 0)),
            pl.BlockSpec((Cout, 1), lambda n, t: (0, 0)),
        ],
        out_specs=pl.BlockSpec((1, Cout, tl), lambda n, t: (n, 0, t)),
        input_output_aliases={0: 0},     # overwrite y2d, it is dead afterwards
        compiler_params=pltpu.CompilerParams(
            dimension_semantics=("parallel", "parallel")),
    )(y2d, scale2, shift2)

    return out2d.reshape(N, Cout, H, W)          # free reshape back to NCHW


if __name__ == "__main__":
    key = jax.random.PRNGKey(0)
    k_x, k_w = jax.random.split(key)

    N, Cin, Cout, H, W = 2, 4, 8, 16, 16
    x = jax.random.normal(k_x, (N, Cin, H, W), dtype=jnp.float32)

    # Deterministic parameter init (shapes per Basic1.__init__):
    fan_in = Cin * 3 * 3
    bound = 1.0 / (fan_in ** 0.5)
    conv_w = jax.random.uniform(
        k_w, (Cout, Cin, 3, 3), dtype=jnp.float32, minval=-bound, maxval=bound
    )
    gamma = jnp.ones((Cout,), jnp.float32)   # bn1 default: weight=1
    beta = jnp.zeros((Cout,), jnp.float32)   # bn1 default: bias=0

    fwd = jax.jit(basic1_forward)
    out = fwd(x, conv_w, gamma, beta)
    jax.block_until_ready(out)
    assert out.shape == (N, Cout, H, W)
    print("KERNEL_OK")
</pallas_src>

<mosaic_0001>
module attributes {stable_mosaic.version = 11 : i64} {
  func.func @conv_stats_kernel(%arg0: i32, %arg1: memref<1x4x384xf32, #tpu.memory_space<vmem>>, %arg2: memref<8x36xbf16, #tpu.memory_space<vmem>>, %arg3: memref<1x8x256xf32, #tpu.memory_space<vmem>>, %arg4: memref<1x8x1xf32, #tpu.memory_space<vmem>>, %arg5: memref<1x8x1xf32, #tpu.memory_space<vmem>>) attributes {dimension_semantics = [#tpu.dimension_semantics<parallel>], iteration_bounds = array<i64: 2>, scalar_prefetch = 0 : i64, scratch_operands = 0 : i64, tpu.core_type = #tpu.core_type<tc>, window_params = [{transform_indices = @transform_0, window_bounds = array<i64: 1, 4, 384>}, {pipeline_mode = #tpu.pipeline_mode<synchronous>, transform_indices = @transform_1, window_bounds = array<i64: 8, 36>}, {transform_indices = @transform_2, window_bounds = array<i64: 1, 8, 256>}, {transform_indices = @transform_3, window_bounds = array<i64: 1, 8, 1>}, {transform_indices = @transform_4, window_bounds = array<i64: 1, 8, 1>}]} {
    %c0 = arith.constant 0 : index
    %c0_0 = arith.constant 0 : index
    %c0_1 = arith.constant 0 : index
    %0 = vector.load %arg1[%c0, %c0_0, %c0_1] : memref<1x4x384xf32, #tpu.memory_space<vmem>>, vector<1x4x384xf32>
    %1 = vector.shape_cast %0 : vector<1x4x384xf32> to vector<4x384xf32>
    %2 = vector.extract_strided_slice %1 {offsets = [0, 0], sizes = [4, 288], strides = [1, 1]} : vector<4x384xf32> to vector<4x288xf32>
    %3 = vector.extract_strided_slice %1 {offsets = [0, 1], sizes = [4, 288], strides = [1, 1]} : vector<4x384xf32> to vector<4x288xf32>
    %4 = vector.extract_strided_slice %1 {offsets = [0, 2], sizes = [4, 288], strides = [1, 1]} : vector<4x384xf32> to vector<4x288xf32>
    %5 = vector.extract_strided_slice %1 {offsets = [0, 18], sizes = [4, 288], strides = [1, 1]} : vector<4x384xf32> to vector<4x288xf32>
    %6 = vector.extract_strided_slice %1 {offsets = [0, 19], sizes = [4, 288], strides = [1, 1]} : vector<4x384xf32> to vector<4x288xf32>
    %7 = vector.extract_strided_slice %1 {offsets = [0, 20], sizes = [4, 288], strides = [1, 1]} : vector<4x384xf32> to vector<4x288xf32>
    %8 = vector.extract_strided_slice %1 {offsets = [0, 36], sizes = [4, 288], strides = [1, 1]} : vector<4x384xf32> to vector<4x288xf32>
    %9 = vector.extract_strided_slice %1 {offsets = [0, 37], sizes = [4, 288], strides = [1, 1]} : vector<4x384xf32> to vector<4x288xf32>
    %10 = vector.extract_strided_slice %1 {offsets = [0, 38], sizes = [4, 288], strides = [1, 1]} : vector<4x384xf32> to vector<4x288xf32>
    %11 = tpu.concatenate %2, %3, %4, %5, %6, %7, %8, %9, %10 in 0 : vector<4x288xf32>, vector<4x288xf32>, vector<4x288xf32>, vector<4x288xf32>, vector<4x288xf32>, vector<4x288xf32>, vector<4x288xf32>, vector<4x288xf32>, vector<4x288xf32> -> vector<36x288xf32>
    %12 = arith.truncf %11 : vector<36x288xf32> to vector<36x288xbf16>
    %c0_2 = arith.constant 0 : index
    %c0_3 = arith.constant 0 : index
    %13 = vector.load %arg2[%c0_2, %c0_3] : memref<8x36xbf16, #tpu.memory_space<vmem>>, vector<8x36xbf16>
    %cst = arith.constant dense<0.000000e+00> : vector<8x288xf32>
    %14 = tpu.matmul %13, %12, %cst {dimension_numbers = #tpu.dot_dimension_numbers<[1], [0], [0], [1], [0, 0, 1, 1], [], []>} : vector<8x36xbf16>, vector<36x288xbf16>, vector<8x288xf32> -> vector<8x288xf32>
    %15 = vector.shape_cast %14 : vector<8x288xf32> to vector<8x16x18xf32>
    %16 = vector.extract_strided_slice %15 {offsets = [0, 0, 0], sizes = [8, 16, 16], strides = [1, 1, 1]} : vector<8x16x18xf32> to vector<8x16x16xf32>
    %17 = vector.shape_cast %16 : vector<8x16x16xf32> to vector<8x256xf32>
    %c0_4 = arith.constant 0 : index
    %c0_5 = arith.constant 0 : index
    %c0_6 = arith.constant 0 : index
    %18 = vector.load %arg3[%c0_4, %c0_5, %c0_6] : memref<1x8x256xf32, #tpu.memory_space<vmem>>, vector<1x8x256xf32>
    %19 = vector.shape_cast %18 : vector<1x8x256xf32> to vector<8x256xf32>
    %20 = vector.shape_cast %17 : vector<8x256xf32> to vector<1x8x256xf32>
    tpu.vector_store %arg3[%c0_4, %c0_5, %c0_6], %20 {strides = array<i32>} : memref<1x8x256xf32, #tpu.memory_space<vmem>>, vector<1x8x256xf32>,
    %cst_7 = arith.constant dense<0.000000e+00> : vector<8xf32>
    %21 = vector.multi_reduction <add>, %17, %cst_7 [1] : vector<8x256xf32> to vector<8xf32>
    %22 = vector.shape_cast %21 : vector<8xf32> to vector<8x1xf32>
    %c0_8 = arith.constant 0 : index
    %c0_9 = arith.constant 0 : index
    %c0_10 = arith.constant 0 : index
    %23 = vector.load %arg4[%c0_8, %c0_9, %c0_10] : memref<1x8x1xf32, #tpu.memory_space<vmem>>, vector<1x8x1xf32>
    %24 = vector.shape_cast %23 : vector<1x8x1xf32> to vector<8x1xf32>
    %25 = vector.shape_cast %22 : vector<8x1xf32> to vector<1x8x1xf32>
    tpu.vector_store %arg4[%c0_8, %c0_9, %c0_10], %25 {strides = array<i32>} : memref<1x8x1xf32, #tpu.memory_space<vmem>>, vector<1x8x1xf32>,
    %26 = arith.mulf %17, %17 : vector<8x256xf32>
    %cst_11 = arith.constant dense<0.000000e+00> : vector<8xf32>
    %27 = vector.multi_reduction <add>, %26, %cst_11 [1] : vector<8x256xf32> to vector<8xf32>
    %28 = vector.shape_cast %27 : vector<8xf32> to vector<8x1xf32>
    %c0_12 = arith.constant 0 : index
    %c0_13 = arith.constant 0 : index
    %c0_14 = arith.constant 0 : index
    %29 = vector.load %arg5[%c0_12, %c0_13, %c0_14] : memref<1x8x1xf32, #tpu.memory_space<vmem>>, vector<1x8x1xf32>
    %30 = vector.shape_cast %29 : vector<1x8x1xf32> to vector<8x1xf32>
    %31 = vector.shape_cast %28 : vector<8x1xf32> to vector<1x8x1xf32>
    tpu.vector_store %arg5[%c0_12, %c0_13, %c0_14], %31 {strides = array<i32>} : memref<1x8x1xf32, #tpu.memory_space<vmem>>, vector<1x8x1xf32>,
    return
  }
  func.func @transform_0(%arg0: i32) -> (i32, i32, i32) {
    %c0_i32 = arith.constant 0 : i32
    %c0_i32_0 = arith.constant 0 : i32
    %c0_i32_1 = arith.constant 0 : i32
    return %arg0, %c0_i32, %c0_i32_0 : i32, i32, i32
  }
  func.func @transform_1(%arg0: i32) -> (i32, i32) {
    %c0_i32 = arith.constant 0 : i32
    %c0_i32_0 = arith.constant 0 : i32
    %c0_i32_1 = arith.constant 0 : i32
    return %c0_i32, %c0_i32_0 : i32, i32
  }
  func.func @transform_2(%arg0: i32) -> (i32, i32, i32) {
    %c0_i32 = arith.constant 0 : i32
    %c0_i32_0 = arith.constant 0 : i32
    %c0_i32_1 = arith.constant 0 : i32
    return %arg0, %c0_i32, %c0_i32_0 : i32, i32, i32
  }
  func.func @transform_3(%arg0: i32) -> (i32, i32, i32) {
    %c0_i32 = arith.constant 0 : i32
    %c0_i32_0 = arith.constant 0 : i32
    %c0_i32_1 = arith.constant 0 : i32
    return %arg0, %c0_i32, %c0_i32_0 : i32, i32, i32
  }
  func.func @transform_4(%arg0: i32) -> (i32, i32, i32) {
    %c0_i32 = arith.constant 0 : i32
    %c0_i32_0 = arith.constant 0 : i32
    %c0_i32_1 = arith.constant 0 : i32
    return %arg0, %c0_i32, %c0_i32_0 : i32, i32, i32
  }
}

module attributes {stable_mosaic.version = 11 : i64} {
  func.func @bn_relu_kernel(%arg0: i32, %arg1: i32, %arg2: memref<1x8x128xf32, #tpu.memory_space<vmem>>, %arg3: memref<8x1xf32, #tpu.memory_space<vmem>>, %arg4: memref<8x1xf32, #tpu.memory_space<vmem>>, %arg5: memref<1x8x128xf32, #tpu.memory_space<vmem>>) attributes {dimension_semantics = [#tpu.dimension_semantics<parallel>, #tpu.dimension_semantics<parallel>], iteration_bounds = array<i64: 2, 2>, scalar_prefetch = 0 : i64, scratch_operands = 0 : i64, tpu.core_type = #tpu.core_type<tc>, window_params = [{transform_indices = @transform_0, window_bounds = array<i64: 1, 8, 128>}, {pipeline_mode = #tpu.pipeline_mode<synchronous>, transform_indices = @transform_1, window_bounds = array<i64: 8, 1>}, {pipeline_mode = #tpu.pipeline_mode<synchronous>, transform_indices = @transform_2, window_bounds = array<i64: 8, 1>}, {transform_indices = @transform_3, window_bounds = array<i64: 1, 8, 128>}]} {
    %c0 = arith.constant 0 : index
    %c0_0 = arith.constant 0 : index
    %c0_1 = arith.constant 0 : index
    %0 = vector.load %arg2[%c0, %c0_0, %c0_1] : memref<1x8x128xf32, #tpu.memory_space<vmem>>, vector<1x8x128xf32>
    %1 = vector.shape_cast %0 : vector<1x8x128xf32> to vector<8x128xf32>
    %c0_2 = arith.constant 0 : index
    %c0_3 = arith.constant 0 : index
    %2 = vector.load %arg3[%c0_2, %c0_3] : memref<8x1xf32, #tpu.memory_space<vmem>>, vector<8x1xf32>
    %3 = vector.broadcast %2 : vector<8x1xf32> to vector<8x128xf32>
    %4 = arith.mulf %1, %3 : vector<8x128xf32>
    %c0_4 = arith.constant 0 : index
    %c0_5 = arith.constant 0 : index
    %5 = vector.load %arg4[%c0_4, %c0_5] : memref<8x1xf32, #tpu.memory_space<vmem>>, vector<8x1xf32>
    %6 = vector.broadcast %5 : vector<8x1xf32> to vector<8x128xf32>
    %7 = arith.addf %4, %6 : vector<8x128xf32>
    %cst = arith.constant 0.000000e+00 : f32
    %8 = vector.broadcast %cst : f32 to vector<8x128xf32>
    %9 = arith.maximumf %7, %8 : vector<8x128xf32>
    %c0_6 = arith.constant 0 : index
    %c0_7 = arith.constant 0 : index
    %c0_8 = arith.constant 0 : index
    %10 = vector.load %arg5[%c0_6, %c0_7, %c0_8] : memref<1x8x128xf32, #tpu.memory_space<vmem>>, vector<1x8x128xf32>
    %11 = vector.shape_cast %10 : vector<1x8x128xf32> to vector<8x128xf32>
    %12 = vector.shape_cast %9 : vector<8x128xf32> to vector<1x8x128xf32>
    tpu.vector_store %arg5[%c0_6, %c0_7, %c0_8], %12 {strides = array<i32>} : memref<1x8x128xf32, #tpu.memory_space<vmem>>, vector<1x8x128xf32>,
    return
  }
  func.func @transform_0(%arg0: i32, %arg1: i32) -> (i32, i32, i32) {
    %c0_i32 = arith.constant 0 : i32
    %c0_i32_0 = arith.constant 0 : i32
    return %arg0, %c0_i32, %arg1 : i32, i32, i32
  }
  func.func @transform_1(%arg0: i32, %arg1: i32) -> (i32, i32) {
    %c0_i32 = arith.constant 0 : i32
    %c0_i32_0 = arith.constant 0 : i32
    %c0_i32_1 = arith.constant 0 : i32
    return %c0_i32, %c0_i32_0 : i32, i32
  }
  func.func @transform_2(%arg0: i32, %arg1: i32) -> (i32, i32) {
    %c0_i32 = arith.constant 0 : i32
    %c0_i32_0 = arith.constant 0 : i32
    %c0_i32_1 = arith.constant 0 : i32
    return %c0_i32, %c0_i32_0 : i32, i32
  }
  func.func @transform_3(%arg0: i32, %arg1: i32) -> (i32, i32, i32) {
    %c0_i32 = arith.constant 0 : i32
    %c0_i32_0 = arith.constant 0 : i32
    return %arg0, %c0_i32, %arg1 : i32, i32, i32
  }
}

</mosaic_0001>

<bundles_post_ra>
// kernel: basic1_forward.3
= control target key start
LH: loop header
LB: loop body
LE: loop exit
PB: predicated region body
PF: predicated region fallthrough
CT: control target
= control target key end

     0   :  { %s419_s12 = smov 0   ;;  %s421_s13 = smov 0   ;;  %s476_s0 = inlined_call_operand.vmem [shape: f32[2,8,256], index: 0, kind: input, shape index: {}, may-alias: {0,3}]   ;;  %s477_s1 = inlined_call_operand.vmem [shape: f32[8,1], index: 1, kind: input, shape index: {}]   ;;  %s478_s2 = inlined_call_operand.vmem [shape: f32[8,1], index: 2, kind: input, shape index: {}]   ;;  %s479_s3 = inlined_call_operand.vmem [shape: f32[2,8,256], index: 3, kind: output, shape index: {}, may-alias: {0,3}]  }
   0x1   :  { %s423_s14 = smov 0   ;;  %s425_s15 = smov 0  }
   0x2   :  { %s427_s16 = smov 0  }
   0x3 LB: > { %s22_s17 = sadd.s32 1, %s388_s14  ;;  %s25_s18 = sadd.s32 1, %s392_s15  ;;  %s396_s16 = sphi %s427_s16, %s13_s16   ;;  %s392_s15 = sphi %s425_s15, %s483_s15   ;;  %s388_s14 = sphi %s423_s14, %s482_s14   ;;  %s384_s13 = sphi %s421_s13, %s481_s13   ;;  %s380_s12 = sphi %s419_s12, %s480_s12  }
   0x4   : > { %p23_p0 = scmp.ge.s32.totalorder %s22_s17, 2  ;;  %p309_p1 = scmp.ge.s32.totalorder %s396_s16, 1 }
   0x5   : > { %p156_p2 = scmp.lt.s32.totalorder %s396_s16, 5 }
   0x6   : > { %s485_s17 = smov (%p23_p0, %s22_s17), 0  ;;  %s487_s18 = smov (!%p23_p0, %s25_s18), %s392_s15 }
   0x7   : > { %p157_p3 = pnand %p309_p1, %p156_p2  ;;  %p27_p4 = scmp.ge.s32.totalorder %s487_s18, 2 }
   0x8   : > { %v203_v0 = vld [vmem:[%s477_s1] sm:$0xff] (!%p157_p3)  ;;  %v398_v1 = vmov (!%p157_p3), 0   ;;  %p186_p5 = scmp.lt.s32.totalorder (!%p157_p3), %s384_s13, 1  ;;  %p188_p6 = scmp.lt.s32.totalorder (!%p157_p3), %s380_s12, 1 }
   0x9   : > { %s489_s18 = smov (%p27_p4, %s487_s18), 0  ;;  %160 = sbr.rel (%p157_p3) target bundleno = 148 (0x94), region = 32 }
   0xa   : > { %357 = vset.pattern.permute.xlu0 (!%p157_p3), %v398_v1  ;;  %v210_v2 = vld [vmem:[%s478_s2] sm:$0xff] (!%p157_p3) }
   0xb   : > { %206 = vperm.xlu0 (!%p157_p3), %357, %v203_v0  }
   0xf   : > { %213 = vperm.xlu0 (!%p157_p3), %357, %v210_v2  }
  0x10   : > { %s491_s13 = smov (!%p186_p5, %s384_s13), 1  ;;  %s493_s12 = smov (!%p188_p6, %s380_s12), 1 }
  0x11   : > { %s310_s23 = sshll.u32 %s491_s13, 1 }
  0x12   : > { %s191_s24 = sadd.s32 %s310_s23, %s493_s12 }
  0x13   : > { %s311_s25 = sshll.u32 %s191_s24, 3 }
  0x14   : > { %s193_s28 = scalar_lea.vmem %s476_s0, %s311_s25  ;;  %s201_s4 = scalar_lea.vmem %s479_s3, %s311_s25 }
  0x15   : > { %v202_v4 = vld [vmem:[%s193_s28] sm:$0xff] }
  0x8a   : > { %v207_v3 = vpop.permute.xlu0 %206 }
  0x8b   : > { %v209_v5 = vmul.f32 %v207_v3, %v202_v4 }
  0x8e   : > { %v214_v6 = vpop.permute.xlu0 %213 }
  0x8f   : > { %v216_v7 = vadd.f32 %v214_v6, %v209_v5 }
  0x91   : > { %v217_v8 = vmax.f32 %v216_v7, 0.0 }
  0x93   : > { %218 = vst [vmem:[%s201_s4] sm:$0xff] %v217_v8 }
  0x94 PF: > { %s13_s16 = sadd.s32 1, %s396_s16   ;;  %s480_s12 = smov %s388_s14 }
  0x95   : > { %p10_p7 = scmp.ge.s32.totalorder %s13_s16, 6   ;;  %s481_s13 = smov %s392_s15 }
  0x96   : > { %s482_s14 = smov %s485_s17  ;;  %s483_s15 = smov %s489_s18 }
  0x97   :  { %12 = sbr.rel (!%p10_p7) target bundleno = 3 (0x3), region = 62 }

// kernel: basic1_forward.2
= control target key start
LH: loop header
LB: loop body
LE: loop exit
PB: predicated region body
PF: predicated region fallthrough
CT: control target
= control target key end

     0   :  { %s1444_s15 = smov 0   ;;  %s1644_s0 = inlined_call_operand.vmem [shape: f32[2,4,384], index: 0, kind: input, shape index: {}]   ;;  %s1645_s1 = inlined_call_operand.vmem [shape: bf16[8,36], index: 1, kind: input, shape index: {}]   ;;  %s1646_s2 = inlined_call_operand.vmem [shape: f32[2,8,256], index: 2, kind: output, shape index: {0}]   ;;  %s1647_s3 = inlined_call_operand.vmem [shape: f32[2,8,1], index: 3, kind: output, shape index: {1}]   ;;  %s1648_s4 = inlined_call_operand.vmem [shape: f32[2,8,1], index: 4, kind: output, shape index: {2}]  }
   0x1 LB: > { %s1249_s16 = sadd.s32 4294967295, %s1385_s15   ;;  %p1253_p0 = scmp.ge.s32.totalorder %s1385_s15, 1  ;;  %s1385_s15 = sphi %s1444_s15, %s15_s15  }
   0x2   : > { %p167_p1 = scmp.lt.s32.totalorder %s1385_s15, 3 }
   0x4   : > { %p168_p2 = pnand %p1253_p0, %p167_p1 }
   0x5   : > { %p201_p3 = scmp.lt.s32.totalorder (!%p168_p2), %s1249_s16, 1  ;;  %v1387_v2 = vmov (!%p168_p2), 0.0   ;;  %s1388_s21 = smov (!%p168_p2), 126   ;;  %vm1395_vm0 = vmmov (!%p168_p2), 0   ;;  %v1396_v9 = vmov (!%p168_p2), 0   ;;  %vm234_vm1 = vcmask (!%p168_p2), 1039360  }
   0x6   : > { %171 = sbr.rel (%p168_p2) target bundleno = 829 (0x33d), region = 28  ;;  %1285 = vmatprep.subr.bf16.mxu1 (!%p168_p2), %v1387_v2  ;;  %s1389_s22 = smov (!%p168_p2), 110   ;;  %1291 = vmatprep.mubr.msk.bf16.mxu1 (!%p168_p2), %vm1395_vm0, %v1387_v2  ;;  %vm324_vm2 = vcmask (!%p168_p2), 1043456   ;;  %vm258_vm3 = vcmask (!%p168_p2), 900096   ;;  %vm246_vm4 = vcmask (!%p168_p2), 1031168   ;;  %vm282_vm5 = vcmask (!%p168_p2), 883712  }
   0x7   : > { %s1390_s23 = smov (!%p168_p2), 127   ;;  %s1391_s24 = smov (!%p168_p2), 109   ;;  %393 = vmatprep.mubr.bf16.mxu0 (!%p168_p2), %v1396_v9  ;;  %vm270_vm6 = vcmask (!%p168_p2), 891904   ;;  %vm306_vm7 = vcmask (!%p168_p2), 744448   ;;  %vm294_vm8 = vcmask (!%p168_p2), 752640   ;;  %vm318_vm9 = vcmask (!%p168_p2), 736256  }
   0x8   : > { %s1392_s25 = smov (!%p168_p2), 108   ;;  %s1393_s26 = smov (!%p168_p2), 92   ;;  %vm351_vm10 = vcmask (!%p168_p2), 1041408   ;;  %vm347_vm11 = vcmask (!%p168_p2), 293888   ;;  %vm466_vm12 = vcmask (!%p168_p2), 15360   ;;  %vm492_vm13 = vcmask (!%p168_p2), 31744  }
   0x9   : > { %s1394_s27 = smov (!%p168_p2), 91   ;;  %s1397_s28 = smov (!%p168_p2), 90   ;;  %vm1098_vm14 = vcmask (!%p168_p2), 130048   ;;  %vm1100_vm15 = vcmask (!%p168_p2), 261120   ;;  %vm1102_vm0 = vcmask (!%p168_p2), 392192  }
   0xa   : > { %s1398_s5 = smov (!%p168_p2), 4   ;;  %s1399_s6 = smov (!%p168_p2), 2  }
   0xb   : > { %s1400_s7 = smov (!%p168_p2), 74   ;;  %s1401_s8 = smov (!%p168_p2), 56  }
   0xc   : > { %s1402_s9 = smov (!%p168_p2), 38   ;;  %s1403_s10 = smov (!%p168_p2), 20  }
   0xd   : > { %s1650_s16 = smov (!%p201_p3, %s1249_s16), 1  ;;  %s1404_s11 = smov 94  }
   0xe   : > { %s1295_s17 = smul.u32 12, %s1650_s16  ;;  %s1405_s12 = smov 112  }
   0xf   : > { %s1406_s13 = smov 58   ;;  %s1407_s14 = smov 76  }
  0x10   : > { %s205_s20 = scalar_lea.vmem %s1644_s0, %s1295_s17  ;;  %s1408_s17 = smov 40  }
  0x11   : > { %v1458_v0 = vld [vmem:[%s205_s20] sm:$0xff]  ;;  %v221_v1 = vld [vmem:[%s205_s20 + $0x8] sm:$0xf]  ;;  %s1409_s18 = smov 22   ;;  %s1410_s19 = smov 114  }
  0x12   : > { %240 = vrot.lane.b32.xlu0 %v1458_v0, %s1388_s21  ;;  %v227_v3 = vcombine.low %v221_v1, %v221_v1  ;;  %v224_v4 = vcombine.high %v1458_v0, %v1458_v0  ;;  %v226_v6 = vcombine.low %v1458_v0, %v1458_v0  ;;  %s1413_s20 = smov 16   ;;  %s1257_s30 = sshll.u32 %s1650_s16, 3 }
  0x14   : > { %v1346_v5 = vpack.i.bf16 %v227_v3, %v1458_v0  ;;  %v1341_v7 = vpack.i.bf16 %v221_v1, %v224_v4  ;;  %v1371_v8 = vpack.i.bf16 %v224_v4, %v1458_v0 }
  0x16   : > { %1347 = vrot.lane.b32.xlu1 %v1346_v5, %s1389_s22  ;;  %1337 = vrot.lane.b32.xlu0 %v1346_v5, %s1390_s23 }
  0x1a   : > { %228 = vrot.lane.b32.xlu1 %v226_v6, %s1390_s23  ;;  %1342 = vrot.lane.b32.xlu0 %v1341_v7, %s1388_s21  ;;  %s1414_s21 = smov 32   ;;  %s1416_s23 = smov 64  }
  0x1e   : > { %252 = vrot.lane.b32.xlu1 %v226_v6, %s1389_s22  ;;  %1352 = vrot.lane.b32.xlu0 %v1341_v7, %s1391_s24 }
  0x22   : > { %1357 = vrot.lane.b32.xlu1 %v1346_v5, %s1392_s25  ;;  %1362 = vrot.lane.b32.xlu0 %v1341_v7, %s1393_s26 }
  0x26   : > { %1367 = vrot.lane.b32.xlu1 %v1346_v5, %s1394_s27  ;;  %264 = vrot.lane.b32.xlu0 %v1458_v0, %s1391_s24  ;;  %s1417_s24 = smov 80  }
  0x2a   : > { %276 = vrot.lane.b32.xlu1 %v226_v6, %s1392_s25  ;;  %288 = vrot.lane.b32.xlu0 %v1458_v0, %s1393_s26  ;;  %s1418_s25 = smov 96  }
  0x2e   : > { %300 = vrot.lane.b32.xlu1 %v226_v6, %s1394_s27  ;;  %1372 = vrot.lane.b32.xlu0 %v1371_v8, %s1397_s28 }
  0x32   : > { %316 = vrot.lane.b32.xlu1 %v221_v1, %s1397_s28 }
  0x84   : > { %v241_v10 = vpop.permute.xlu0 %240 }
  0x88   : > { %v1348_v11 = vpop.permute.xlu1 %1347  ;;  %v1338_v12 = vpop.permute.xlu0 %1337 }
  0x89   : > { %v1340_v13 = vunpack.i.h.bf16 %v1338_v12  ;;  %v1339_v14 = vunpack.i.l.bf16 %v1338_v12  ;;  %v1350_v15 = vunpack.i.h.bf16 %v1348_v11  ;;  %v1349_v16 = vunpack.i.l.bf16 %v1348_v11 }
  0x8b   : > { %v236_v21 = vsel %vm234_vm1, %v1339_v14, %v1340_v13  ;;  %v327_v22 = vsel %vm324_vm2, %v221_v1, %v1340_v13  ;;  %v260_v26 = vsel %vm258_vm3, %v1349_v16, %v1350_v15 }
  0x8c   : > { %v229_v17 = vpop.permute.xlu1 %228  ;;  %v1343_v18 = vpop.permute.xlu0 %1342  ;;  %v326_v30 = vsel %vm324_vm2, %v224_v4, %v236_v21 }
  0x8d   : > { %v1345_v19 = vunpack.i.h.bf16 %v1343_v18  ;;  %v1344_v20 = vunpack.i.l.bf16 %v1343_v18  ;;  %v235_v23 = vsel %vm234_vm1, %v229_v17, %v1339_v14  ;;  %v346_v17 = vld [vmem:[%s1645_s1] sm:$0xf]  ;;  %vm1104_vm1 = vcmask 523264  }
  0x8e   : > { %v325_v35 = vsel %vm324_vm2, %v1458_v0, %v235_v23 }
  0x8f   : > { %v330_v24 = vsel %vm324_vm2, %v1345_v19, %v1350_v15  ;;  %v248_v25 = vsel %vm246_vm4, %v1344_v20, %v1345_v19  ;;  %v247_v34 = vsel %vm246_vm4, %v241_v10, %v1344_v20  ;;  %vm1110_vm4 = vcmask 916480  }
  0x90   : > { %v253_v27 = vpop.permute.xlu1 %252  ;;  %v1353_v28 = vpop.permute.xlu0 %1352  ;;  %v339_v29 = vpack.c.bf16 %v330_v24, %v327_v22  ;;  %v329_v31 = vsel %vm324_vm2, %v248_v25, %v260_v26  ;;  %v1411_v26 = vmov 1983009808  }
  0x91   : > { %v259_v32 = vsel %vm258_vm3, %v253_v27, %v1349_v16  ;;  %v338_v33 = vpack.c.bf16 %v329_v31, %v326_v30  ;;  %v1355_v42 = vunpack.i.h.bf16 %v1353_v28  ;;  %v1354_v43 = vunpack.i.l.bf16 %v1353_v28 }
  0x92   : > { %1286 = vmatpush3.bf16.msra.mxu1 %v339_v29  ;;  %v328_v36 = vsel %vm324_vm2, %v247_v34, %v259_v32  ;;  %v501_v27 = vunpack.c.l.s4 %v1411_v26  ;;  %v503_v28 = vlaneseq  ;;  %v1412_v31 = vmov 1934713408  }
  0x93   : > { %361 = vmatprep.subr.bf16.mxu0 %v338_v33  ;;  %v337_v37 = vpack.c.bf16 %v328_v36, %v325_v35  ;;  %1287 = vmatprep.subr.bf16.mxu1 %v1387_v2  ;;  %v272_v51 = vsel %vm270_vm6, %v1354_v43, %v1355_v42  ;;  %v565_v32 = vunpack.c.l.s4 %v1412_v31  ;;  %vm1108_vm3 = vcmask 785408  }
  0x94   : > { %v1358_v38 = vpop.permute.xlu1 %1357  ;;  %v1363_v39 = vpop.permute.xlu0 %1362  ;;  %v502_v33 = vunpack.c.0.s8 %v501_v27  ;;  %v504_v34 = vshrl.u32 %v503_v28, 7 }
  0x95   : > { %v1360_v40 = vunpack.i.h.bf16 %v1358_v38  ;;  %v1359_v41 = vunpack.i.l.bf16 %v1358_v38  ;;  %362 = vmatpush1.bf16.msra.mxu0 %v337_v37  ;;  %v1365_v44 = vunpack.i.h.bf16 %v1363_v39  ;;  %v1364_v45 = vunpack.i.l.bf16 %v1363_v39 }
  0x96   : > { %v566_v37 = vunpack.c.0.s8 %v565_v32  ;;  %v1510_v38 = vsub.s32 %v502_v33, %v504_v34 }
  0x97   : > { %v284_v50 = vsel %vm282_vm5, %v1359_v41, %v1360_v40  ;;  %v296_v53 = vsel %vm294_vm8, %v1364_v45, %v1365_v44  ;;  %v333_v54 = vsel %vm324_vm2, %v1355_v42, %v1360_v40 }
  0x98   : > { %v1368_v46 = vpop.permute.xlu1 %1367  ;;  %v265_v47 = vpop.permute.xlu0 %264  ;;  %v332_v59 = vsel %vm324_vm2, %v272_v51, %v284_v50 }
  0x99   : > { %v1370_v48 = vunpack.i.h.bf16 %v1368_v46  ;;  %v1369_v49 = vunpack.i.l.bf16 %v1368_v46  ;;  %v271_v63 = vsel %vm270_vm6, %v265_v47, %v1354_v43 }
  0x9b   : > { %v308_v52 = vsel %vm306_vm7, %v1369_v49, %v1370_v48  ;;  %v336_v55 = vsel %vm324_vm2, %v1365_v44, %v1370_v48 }
  0x9c   : > { %v277_v56 = vpop.permute.xlu1 %276  ;;  %v289_v57 = vpop.permute.xlu0 %288  ;;  %v342_v58 = vpack.c.bf16 %v336_v55, %v333_v54  ;;  %v335_v60 = vsel %vm324_vm2, %v296_v53, %v308_v52 }
  0x9d   : > { %v341_v61 = vpack.c.bf16 %v335_v60, %v332_v59  ;;  %v283_v62 = vsel %vm282_vm5, %v277_v56, %v1359_v41  ;;  %v295_v3 = vsel %vm294_vm8, %v289_v57, %v1364_v45  ;;  %v1512_v45 = vsub.s32 %v566_v37, %v504_v34 }
  0x9e   : > { %1288 = vmatpush3.bf16.msra.mxu1 %v342_v58  ;;  %v331_v7 = vsel %vm324_vm2, %v271_v63, %v283_v62  ;;  %vm1124_vm5 = vcmask 7168  }
  0x9f   : > { %363 = vmatprep.subr.bf16.mxu0 %v341_v61  ;;  %1289 = vmatprep.subr.bf16.mxu1 %v1387_v2 }
  0xa0   : > { %v301_v0 = vpop.permute.xlu1 %300  ;;  %v1373_v1 = vpop.permute.xlu0 %1372 }
  0xa1   : > { %v307_v4 = vsel %vm306_vm7, %v301_v0, %v1369_v49  ;;  %v1375_v5 = vunpack.i.h.bf16 %v1373_v1  ;;  %v1374_v6 = vunpack.i.l.bf16 %v1373_v1 }
  0xa2   : > { %v334_v8 = vsel %vm324_vm2, %v295_v3, %v307_v4  ;;  %vm1106_vm2 = vcmask 654336  }
  0xa3   : > { %v340_v9 = vpack.c.bf16 %v334_v8, %v331_v7  ;;  %v319_v10 = vsel %vm318_vm9, %v1374_v6, %v1375_v5 }
  0xa4   : > { %v317_v11 = vpop.permute.xlu1 %316  ;;  %v343_v2 = vpack.c.bf16 %v319_v10, %v319_v10 }
  0xa5   : > { %v320_v12 = vsel %vm318_vm9, %v1375_v5, %v317_v11  ;;  %v345_v13 = vpack.c.bf16 %v317_v11, %v317_v11  ;;  %364 = vmatpush1.bf16.msra.mxu0 %v340_v9 }
  0xa6   : > { %v344_v14 = vpack.c.bf16 %v320_v12, %v320_v12  ;;  %v353_v15 = vsel %vm351_vm10, %v343_v2, 0 }
  0xa7   : > { %v359_v16 = vsel %vm351_vm10, %v345_v13, 0 }
  0xa8   : > { %1259 = vmatprep.subr.msk.bf16.mxu0 %vm351_vm10, %v344_v14  ;;  %1290 = vmatpush3.bf16.msra.mxu1 %v359_v16 }
  0xa9   : > { %366 = vmatpush1.bf16.msra.mxu0 %v353_v15 }
  0xab   : > { %1292 = vmatmul.mubr.msk.bf16.vlgmr.msra.gmra.mrb[0].mxu1 %vm347_vm11, %v346_v17 }
  0xac   : > { %1260 = vmatmul.mubr.msk.bf16.vlgmr.msra.gmra.mrb[0].mxu0 %vm347_vm11, %v346_v17 }
 0x17e   : > { %v436_v18 = vpop.f32.mrb[0].mxu1 }
 0x17f   : > { %490 = vrot.lane.b32.xlu0 %v436_v18, %s1398_s5  ;;  %v395_v19 = vpop.f32.mrb[0].mxu0  ;;  %v1293_v20 = vpop.f32.mrb[1].mxu1 }
 0x180   : > { %v439_v21 = vpop.f32.mrb[2].mxu1  ;;  %446 = vrot.lane.b32.xlu1 %v395_v19, %s1393_s26  ;;  %v397_v22 = vpop.f32.mrb[1].mxu0  ;;  %s1280_s26 = sshll.u32 %s1650_s16, 4 }
 0x181   : > { %v399_v23 = vpop.f32.mrb[2].mxu0  ;;  %v1294_v24 = vpop.f32.mrb[3].mxu1  ;;  %s210_s29 = scalar_lea.vmem %s1646_s2, %s1280_s26 }
 0x182   : > { %v400_v25 = vpop.f32.mrb[3].mxu0 }
 0x183   : > { %443 = vrot.lane.b32.xlu0 %v395_v19, %s1389_s22  ;;  %s1415_s22 = smov 48  }
 0x184   : > { %462 = vrot.lane.b32.xlu1 %v395_v19, %s1399_s6 }
 0x187   : > { %449 = vrot.lane.b32.xlu0 %v395_v19, %s1400_s7  ;;  %s214_s7 = scalar_lea.vmem %s1647_s3, %s1257_s30 }
 0x188   : > { %452 = vrot.lane.b32.xlu1 %v395_v19, %s1401_s8 }
 0x18b   : > { %455 = vrot.lane.b32.xlu0 %v395_v19, %s1402_s9 }
 0x18c   : > { %458 = vrot.lane.b32.xlu1 %v395_v19, %s1403_s10  ;;  %s218_s10 = scalar_lea.vmem %s1648_s4, %s1257_s30 }
 0x18f   : > { %472 = vrot.lane.b32.xlu0 %v397_v22, %s1404_s11 }
 0x190   : > { %469 = vrot.lane.b32.xlu1 %v397_v22, %s1405_s12 }
 0x193   : > { %478 = vrot.lane.b32.xlu0 %v397_v22, %s1406_s13 }
 0x194   : > { %475 = vrot.lane.b32.xlu1 %v397_v22, %s1407_s14 }
 0x197   : > { %464 = vrot.lane.b32.xlu0 %v397_v22, %s1399_s6 }
 0x198   : > { %488 = vrot.lane.b32.xlu1 %v397_v22, %s1398_s5 }
 0x19b   : > { %481 = vrot.lane.b32.xlu0 %v397_v22, %s1408_s17 }
 0x19c   : > { %484 = vrot.lane.b32.xlu1 %v397_v22, %s1409_s18 }
 0x19f   : > { %495 = vrot.lane.b32.xlu0 %v436_v18, %s1410_s19 }
 0x1f1   : > { %v1508_v29 = vpop.permute.xlu0 %490 }
 0x1f2   : > { %v447_v30 = vpop.permute.xlu1 %446 }
 0x1f3   : > { %v498_v39 = vcombine.low %v395_v19, %v447_v30  ;;  %v499_v40 = vcombine.high %v395_v19, %v447_v30 }
 0x1f5   : > { %v444_v35 = vpop.permute.xlu0 %443  ;;  %v506_v46 = vrot.slane %v498_v39, %v1510_v38  ;;  %v513_v47 = vrot.slane %v499_v40, %v1510_v38 }
 0x1f6   : > { %v463_v36 = vpop.permute.xlu1 %462 }
 0x1f9   : > { %v450_v41 = vpop.permute.xlu0 %449 }
 0x1fa   : > { %v514_v42 = vcombine.low %v444_v35, %v450_v41  ;;  %v515_v43 = vcombine.high %v444_v35, %v450_v41  ;;  %v453_v44 = vpop.permute.xlu1 %452 }
 0x1fc   : > { %v522_v48 = vrot.slane %v514_v42, %v1510_v38  ;;  %v529_v49 = vrot.slane %v515_v43, %v1510_v38 }
 0x1fd   : > { %v1518_v50 = vpop.permute.xlu0 %455 }
 0x1fe   : > { %v562_v51 = vcombine.low %v506_v46, %v522_v48  ;;  %v563_v52 = vcombine.high %v506_v46, %v522_v48  ;;  %v578_v53 = vcombine.low %v513_v47, %v529_v49  ;;  %v579_v54 = vcombine.high %v513_v47, %v529_v49  ;;  %v459_v55 = vpop.permute.xlu1 %458 }
 0x1ff   : > { %v530_v60 = vcombine.low %v453_v44, %v459_v55  ;;  %v531_v8 = vcombine.high %v453_v44, %v459_v55 }
 0x200   : > { %v570_v56 = vrot.slane %v562_v51, %v1512_v45  ;;  %v577_v57 = vrot.slane %v563_v52, %v1512_v45  ;;  %v586_v58 = vrot.slane %v578_v53, %v1512_v45  ;;  %v593_v59 = vrot.slane %v579_v54, %v1512_v45 }
 0x201   : > { %v473_v61 = vpop.permute.xlu0 %472  ;;  %v1529_v9 = vrot.slane %v530_v60, %v1510_v38  ;;  %v545_v28 = vrot.slane %v531_v8, %v1510_v38 }
 0x202   : > { %v1262_v62 = vcombine.low %v570_v56, %v577_v57  ;;  %v1264_v63 = vcombine.high %v570_v56, %v577_v57  ;;  %v1266_v0 = vcombine.low %v586_v58, %v593_v59  ;;  %v1268_v1 = vcombine.high %v586_v58, %v593_v59  ;;  %v470_v3 = vpop.permute.xlu1 %469 }
 0x204   : > { %v778_v4 = vrot.slane %v1262_v62, %v1510_v38  ;;  %v794_v5 = vrot.slane %v1264_v63, %v1510_v38  ;;  %v810_v6 = vrot.slane %v1266_v0, %v1510_v38  ;;  %v826_v7 = vrot.slane %v1268_v1, %v1510_v38 }
 0x205   : > { %v479_v10 = vpop.permute.xlu0 %478 }
 0x206   : > { %v650_v11 = vcombine.low %v473_v61, %v479_v10  ;;  %v651_v2 = vcombine.high %v473_v61, %v479_v10  ;;  %v476_v12 = vpop.permute.xlu1 %475  ;;  %v834_v13 = vcombine.low %v778_v4, %v794_v5  ;;  %v866_v14 = vcombine.low %v810_v6, %v826_v7 }
 0x207   : > { %v634_v15 = vcombine.low %v470_v3, %v476_v12  ;;  %v635_v16 = vcombine.high %v470_v3, %v476_v12  ;;  %v835_v17 = vcombine.high %v778_v4, %v794_v5  ;;  %v867_v18 = vcombine.high %v810_v6, %v826_v7 }
 0x208   : > { %v658_v19 = vrot.slane %v650_v11, %v1510_v38  ;;  %v665_v20 = vrot.slane %v651_v2, %v1510_v38  ;;  %v1534_v21 = vrot.slane %v834_v13, %v1512_v45  ;;  %v1537_v22 = vrot.slane %v866_v14, %v1512_v45 }
 0x209   : > { %v642_v23 = vrot.slane %v634_v15, %v1510_v38  ;;  %v649_v24 = vrot.slane %v635_v16, %v1510_v38  ;;  %v465_v25 = vpop.permute.xlu0 %464  ;;  %v849_v26 = vrot.slane %v835_v17, %v1512_v45  ;;  %v881_v27 = vrot.slane %v867_v18, %v1512_v45 }
 0x20a   : > { %v467_v30 = vsel %vm466_vm12, %v463_v36, %v465_v25  ;;  %v489_v31 = vpop.permute.xlu1 %488  ;;  %v899_v32 = vcombine.high %v1534_v21, %v1537_v22  ;;  %v898_v33 = vcombine.low %v1534_v21, %v1537_v22 }
 0x20b   : > { %v698_v34 = vcombine.low %v642_v23, %v658_v19  ;;  %v699_v35 = vcombine.high %v642_v23, %v658_v19  ;;  %v714_v37 = vcombine.low %v649_v24, %v665_v20  ;;  %v715_v39 = vcombine.high %v649_v24, %v665_v20 }
 0x20c   : > { %v546_v40 = vcombine.low %v1518_v50, %v467_v30  ;;  %v547_v41 = vcombine.high %v1518_v50, %v467_v30  ;;  %v493_v42 = vsel %vm492_vm13, %v489_v31, %v1508_v29  ;;  %1043 = vrot.lane.b32.xlu1 %v899_v32, %s1413_s20  ;;  %v900_v36 = vcombine.low %v849_v26, %v881_v27 }
 0x20d   : > { %v706_v43 = vrot.slane %v698_v34, %v1512_v45  ;;  %v713_v44 = vrot.slane %v699_v35, %v1512_v45  ;;  %v722_v46 = vrot.slane %v714_v37, %v1512_v45  ;;  %v729_v47 = vrot.slane %v715_v39, %v1512_v45  ;;  %v482_v48 = vpop.permute.xlu0 %481 }
 0x20e   : > { %v554_v49 = vrot.slane %v546_v40, %v1510_v38  ;;  %v561_v50 = vrot.slane %v547_v41, %v1510_v38  ;;  %v666_v51 = vcombine.low %v482_v48, %v493_v42  ;;  %v667_v52 = vcombine.high %v482_v48, %v493_v42  ;;  %v485_v6 = vpop.permute.xlu1 %484 }
 0x20f   : > { %v1270_v29 = vcombine.low %v706_v43, %v713_v44  ;;  %v1272_v53 = vcombine.high %v706_v43, %v713_v44  ;;  %v1274_v54 = vcombine.low %v722_v46, %v729_v47  ;;  %v1276_v55 = vcombine.high %v722_v46, %v729_v47 }
 0x210   : > { %v594_v56 = vcombine.low %v1529_v9, %v554_v49  ;;  %v595_v57 = vcombine.high %v1529_v9, %v554_v49  ;;  %v610_v58 = vcombine.low %v545_v28, %v561_v50  ;;  %v611_v59 = vcombine.high %v545_v28, %v561_v50  ;;  %1047 = vrot.lane.b32.xlu1 %v900_v36, %s1414_s21 }
 0x211   : > { %v674_v60 = vrot.slane %v666_v51, %v1510_v38  ;;  %v681_v61 = vrot.slane %v667_v52, %v1510_v38  ;;  %v496_v62 = vpop.permute.xlu0 %495  ;;  %v901_v63 = vcombine.high %v849_v26, %v881_v27  ;;  %v914_v0 = vrot.slane %v1270_v29, %v1510_v38 }
 0x212   : > { %v602_v1 = vrot.slane %v594_v56, %v1512_v45  ;;  %v609_v3 = vrot.slane %v595_v57, %v1512_v45  ;;  %v618_v4 = vrot.slane %v610_v58, %v1512_v45  ;;  %v625_v5 = vrot.slane %v611_v59, %v1512_v45 }
 0x213   : > { %v682_v7 = vcombine.low %v485_v6, %v496_v62  ;;  %v683_v8 = vcombine.high %v485_v6, %v496_v62  ;;  %v930_v9 = vrot.slane %v1272_v53, %v1510_v38  ;;  %v946_v10 = vrot.slane %v1274_v54, %v1510_v38 }
 0x214   : > { %v1263_v11 = vcombine.low %v602_v1, %v609_v3  ;;  %v1265_v2 = vcombine.high %v602_v1, %v609_v3  ;;  %v1267_v12 = vcombine.low %v618_v4, %v625_v5  ;;  %v1269_v13 = vcombine.high %v618_v4, %v625_v5  ;;  %1051 = vrot.lane.b32.xlu1 %v901_v63, %s1415_s22 }
 0x215   : > { %v690_v14 = vrot.slane %v682_v7, %v1510_v38  ;;  %v697_v15 = vrot.slane %v683_v8, %v1510_v38  ;;  %v962_v16 = vrot.slane %v1276_v55, %v1510_v38  ;;  %v970_v17 = vcombine.low %v914_v0, %v930_v9 }
 0x216   : > { %v785_v18 = vrot.slane %v1263_v11, %v1510_v38  ;;  %v801_v19 = vrot.slane %v1265_v2, %v1510_v38  ;;  %v817_v20 = vrot.slane %v1267_v12, %v1510_v38  ;;  %v833_v23 = vrot.slane %v1269_v13, %v1510_v38 }
 0x217   : > { %v730_v24 = vcombine.low %v674_v60, %v690_v14  ;;  %v731_v25 = vcombine.high %v674_v60, %v690_v14  ;;  %v746_v26 = vcombine.low %v681_v61, %v697_v15  ;;  %v747_v27 = vcombine.high %v681_v61, %v697_v15 }
 0x218   : > { %v1581_v28 = vrot.slane %v970_v17, %v1512_v45  ;;  %v1002_v30 = vcombine.low %v946_v10, %v962_v16  ;;  %v850_v31 = vcombine.low %v785_v18, %v801_v19  ;;  %v882_v32 = vcombine.low %v817_v20, %v833_v23 }
 0x219   : > { %v738_v34 = vrot.slane %v730_v24, %v1512_v45  ;;  %v745_v35 = vrot.slane %v731_v25, %v1512_v45  ;;  %v754_v37 = vrot.slane %v746_v26, %v1512_v45  ;;  %v761_v39 = vrot.slane %v747_v27, %v1512_v45 }
 0x21a   : > { %v1588_v40 = vrot.slane %v1002_v30, %v1512_v45  ;;  %v858_v41 = vrot.slane %v850_v31, %v1512_v45  ;;  %v890_v42 = vrot.slane %v882_v32, %v1512_v45  ;;  %v971_v36 = vcombine.high %v914_v0, %v930_v9 }
 0x21b   : > { %v1271_v43 = vcombine.low %v738_v34, %v745_v35  ;;  %v1273_v44 = vcombine.high %v738_v34, %v745_v35  ;;  %v1275_v46 = vcombine.low %v754_v37, %v761_v39  ;;  %v1277_v47 = vcombine.high %v754_v37, %v761_v39 }
 0x21c   : > { %v1035_v48 = vcombine.high %v1581_v28, %v1588_v40  ;;  %v902_v49 = vcombine.low %v858_v41, %v890_v42  ;;  %v985_v50 = vrot.slane %v971_v36, %v1512_v45  ;;  %v1003_v51 = vcombine.high %v946_v10, %v962_v16 }
 0x21d   : > { %v851_v52 = vcombine.high %v785_v18, %v801_v19  ;;  %v883_v29 = vcombine.high %v817_v20, %v833_v23  ;;  %v921_v53 = vrot.slane %v1271_v43, %v1510_v38  ;;  %v937_v55 = vrot.slane %v1273_v44, %v1510_v38 }
 0x21e   : > { %1071 = vrot.lane.b32.xlu0 %v1035_v48, %s1413_s20  ;;  %1055 = vrot.lane.b32.xlu1 %v902_v49, %s1416_s23  ;;  %v1017_v54 = vrot.slane %v1003_v51, %v1512_v45  ;;  %v953_v56 = vrot.slane %v1275_v46, %v1510_v38  ;;  %v903_v57 = vcombine.high %v858_v41, %v890_v42 }
 0x21f   : > { %v969_v58 = vrot.slane %v1277_v47, %v1510_v38  ;;  %v1034_v59 = vcombine.low %v1581_v28, %v1588_v40  ;;  %v865_v61 = vrot.slane %v851_v52, %v1512_v45  ;;  %v897_v62 = vrot.slane %v883_v29, %v1512_v45 }
 0x220   : > { %v1036_v60 = vcombine.low %v985_v50, %v1017_v54  ;;  %v986_v63 = vcombine.low %v921_v53, %v937_v55  ;;  %v1037_v4 = vcombine.high %v985_v50, %v1017_v54  ;;  %v987_v7 = vcombine.high %v921_v53, %v937_v55 }
 0x221   : > { %v1018_v0 = vcombine.low %v953_v56, %v969_v58  ;;  %v904_v38 = vcombine.low %v865_v61, %v897_v62  ;;  %v905_v6 = vcombine.high %v865_v61, %v897_v62  ;;  %v1019_v8 = vcombine.high %v953_v56, %v969_v58 }
 0x222   : > { %1075 = vrot.lane.b32.xlu0 %v1036_v60, %s1414_s21  ;;  %1059 = vrot.lane.b32.xlu1 %v903_v57, %s1417_s24  ;;  %v994_v1 = vrot.slane %v986_v63, %v1512_v45  ;;  %v1001_v10 = vrot.slane %v987_v7, %v1512_v45 }
 0x223   : > { %v1026_v3 = vrot.slane %v1018_v0, %v1512_v45  ;;  %v1033_v11 = vrot.slane %v1019_v8, %v1512_v45 }
 0x225   : > { %v1038_v5 = vcombine.low %v994_v1, %v1026_v3  ;;  %v1039_v9 = vcombine.high %v994_v1, %v1026_v3  ;;  %v1040_v2 = vcombine.low %v1001_v10, %v1033_v11  ;;  %v1041_v12 = vcombine.high %v1001_v10, %v1033_v11 }
 0x226   : > { %1079 = vrot.lane.b32.xlu0 %v1037_v4, %s1415_s22  ;;  %1063 = vrot.lane.b32.xlu1 %v904_v38, %s1418_s25 }
 0x22a   : > { %1083 = vrot.lane.b32.xlu0 %v1038_v5, %s1416_s23  ;;  %1067 = vrot.lane.b32.xlu1 %v905_v6, %s1405_s12 }
 0x22e   : > { %1087 = vrot.lane.b32.xlu0 %v1039_v9, %s1417_s24 }
 0x232   : > { %1091 = vrot.lane.b32.xlu0 %v1040_v2, %s1418_s25 }
 0x236   : > { %1095 = vrot.lane.b32.xlu0 %v1041_v12, %s1405_s12 }
 0x27e   : > { %v1044_v13 = vpop.permute.xlu1 %1043 }
 0x27f   : > { %v1099_v45 = vsel %vm1098_vm14, %v898_v33, %v1044_v13 }
 0x282   : > { %v1048_v14 = vpop.permute.xlu1 %1047 }
 0x283   : > { %v1101_v20 = vsel %vm1100_vm15, %v1099_v45, %v1048_v14 }
 0x286   : > { %v1052_v15 = vpop.permute.xlu1 %1051 }
 0x287   : > { %v1103_v25 = vsel %vm1102_vm0, %v1101_v20, %v1052_v15 }
 0x290   : > { %v1072_v16 = vpop.permute.xlu0 %1071  ;;  %v1056_v17 = vpop.permute.xlu1 %1055 }
 0x291   : > { %v1105_v26 = vsel %vm1104_vm1, %v1103_v25, %v1056_v17  ;;  %v1112_v31 = vsel %vm1098_vm14, %v1034_v59, %v1072_v16 }
 0x294   : > { %v1076_v18 = vpop.permute.xlu0 %1075  ;;  %v1060_v19 = vpop.permute.xlu1 %1059 }
 0x295   : > { %v1107_v27 = vsel %vm1106_vm2, %v1105_v26, %v1060_v19  ;;  %v1113_v32 = vsel %vm1100_vm15, %v1112_v31, %v1076_v18 }
 0x298   : > { %v1080_v23 = vpop.permute.xlu0 %1079  ;;  %v1064_v24 = vpop.permute.xlu1 %1063 }
 0x299   : > { %v1109_v22 = vsel %vm1108_vm3, %v1107_v27, %v1064_v24  ;;  %v1114_v35 = vsel %vm1102_vm0, %v1113_v32, %v1080_v23 }
 0x29c   : > { %v1084_v21 = vpop.permute.xlu0 %1083  ;;  %v1068_v33 = vpop.permute.xlu1 %1067 }
 0x29d   : > { %v1111_v28 = vsel %vm1110_vm4, %v1109_v22, %v1068_v33  ;;  %v1115_v37 = vsel %vm1104_vm1, %v1114_v35, %v1084_v21 }
 0x29e   : > { %1119 = vst [vmem:[%s210_s29] sm:$0xff] %v1111_v28  ;;  %v1126_v43 = vmul.f32 %v1111_v28, %v1111_v28 }
 0x2a0   : > { %v1088_v30 = vpop.permute.xlu0 %1087 }
 0x2a1   : > { %v1116_v39 = vsel %vm1106_vm2, %v1115_v37, %v1088_v30 }
 0x2a4   : > { %v1092_v34 = vpop.permute.xlu0 %1091 }
 0x2a5   : > { %v1117_v40 = vsel %vm1108_vm3, %v1116_v39, %v1092_v34 }
 0x2a8   : > { %v1096_v41 = vpop.permute.xlu0 %1095 }
 0x2a9   : > { %v1118_v42 = vsel %vm1110_vm4, %v1117_v40, %v1096_v41 }
 0x2aa   : > { %1120 = vst [vmem:[%s210_s29 + $0x8] sm:$0xff] %v1118_v42  ;;  %v1121_v36 = vadd.f32 %v1118_v42, %v1111_v28  ;;  %v1127_v44 = vmul.f32 %v1118_v42, %v1118_v42 }
 0x2ac   : > { %1122 = vadd.xlane.f32.xlu1 %v1121_v36  ;;  %v1128_v46 = vadd.f32 %v1127_v44, %v1126_v43 }
 0x2ae   : > { %1129 = vadd.xlane.f32.xlu0 %v1128_v46 }
 0x339   : > { %v1123_v47 = vpop.xlane.xlu1 %1122 }
 0x33a   : > { %1125 = vst.msk [vmem:[%s214_s7] sm:$0xff] %vm1124_vm5, %v1123_v47 }
 0x33b   : > { %v1130_v48 = vpop.xlane.xlu0 %1129 }
 0x33c   : > { %1131 = vst.msk [vmem:[%s218_s10] sm:$0xff] %vm1124_vm5, %v1130_v48 }
 0x33d PF: > { %s15_s15 = sadd.s32 1, %s1385_s15  }
 0x33e   : > { %p12_p4 = scmp.ge.s32.totalorder %s15_s15, 4  }
 0x340   :  { %14 = sbr.rel (!%p12_p4) target bundleno = 1 (0x1), region = 82 }

</bundles_post_ra>
